<compile_context>
chip_gen: v5e
topology: v5e:2x2
jax: 0.10.0
libtpu: 0.0.40
codegen_flags: <defaults>
</compile_context>

<pallas_src>
import numpy as np
import jax
import jax.numpy as jnp
from jax.experimental import pallas as pl
from jax.experimental.pallas import tpu as pltpu

TEMPERATURE = 20.0        # self.temperature
BASE_TEMPERATURE = 0.1    # self.base_temperature
N_VIEW = 100

MAX_LOGITS_TILE_BYTES = 4 * 1024 * 1024   # per-step logits block budget (f32 terms)
MIN_TILE_ROWS = 512                       # below this per-step overhead dominates


def _round_up(x, m):
    return ((x + m - 1) // m) * m


def _choose_rows_tiling(n_rows, max_rows):
    """Pick (tile_rows, padded_rows) so tile_rows divides padded_rows exactly
    (no partially-out-of-bounds blocks) and satisfies the (8,128) constraint."""
    max_rows8 = max(8, (max_rows // 8) * 8)
    if n_rows <= max_rows8:
        return n_rows, n_rows                 # single full-dim tile, no pad
    t_min = max(8, min(MIN_TILE_ROWS, max_rows8 // 2))
    t = max_rows8
    while t >= t_min:
        if n_rows % t == 0:
            return t, n_rows                  # exact divisor -> no padding copy
        t -= 8
    # TODO(synk): awkward row count with no usable divisor -> pad rows (one extra
    # copy of the logits volume); not hit for typical power-of-two-ish 3D volumes.
    return max_rows8, _round_up(n_rows, max_rows8)


# ---------------------------------------------------------------------------
# Kernel 1: tiled mean cross-entropy over all pixels.
#   ce_i = logsumexp(logits_i) - logits_i[target_i];  loss = mean_i ce_i
# Layout: logits (K, TILE_ROWS, 128) class-major dense blocks, targets
# (TILE_ROWS, 128) int, per-(batch, chunk) lane-wise partial sums in a resident
# (1, 128) output block.
# TODO(synk): the dependent `CrossEntropyLoss` class is not provided; standard
#             nn.CrossEntropyLoss (mean reduction, no ignore_index) is assumed.
# ---------------------------------------------------------------------------
def ce_kernel(logits_ref, tgt_ref, o_ref):
    @pl.when(pl.program_id(2) == 0)
    def _():
        o_ref[...] = jnp.zeros_like(o_ref)

    t = tgt_ref[...].astype(jnp.int32)             # (R, 128); -1 marks padding
    valid = t >= 0
    K = logits_ref.shape[0]

    if K == 2:
        # ce = logsumexp(x0, x1) - x_target == softplus(x_other - x_target)
        # (stabilized: max(z,0) + log(1+exp(-|z|)); assumes valid labels are {0,1},
        #  -1 padding is masked below).
        x0 = logits_ref[0].astype(jnp.float32)     # (R, 128) dense vregs
        x1 = logits_ref[1].astype(jnp.float32)
        z = jnp.where(t == 1, x0 - x1, x1 - x0)    # x_other - x_target
        ce = jnp.maximum(z, 0.0) + jnp.log(1.0 + jnp.exp(-jnp.abs(z)))
    else:
        x = logits_ref[...].astype(jnp.float32)    # (K, R, 128)
        m = jnp.max(x, axis=0)
        lse = jnp.log(jnp.sum(jnp.exp(x - m[None]), axis=0)) + m
        k_iota = jax.lax.broadcasted_iota(jnp.int32, x.shape, 0)
        picked = jnp.sum(jnp.where(k_iota == t[None], x, 0.0), axis=0)
        ce = lse - picked

    ce = jnp.where(valid, ce, 0.0)
    # Lane-wise partial accumulation; the single cross-lane reduce is done in XLA.
    o_ref[...] += jnp.sum(ce, axis=0, keepdims=True)


def cross_entropy_loss(seg, target):
    """seg: (B, K, *spatial) logits; target: (B, *spatial) int labels."""
    B, K = int(seg.shape[0]), int(seg.shape[1])
    n_spatial = int(np.prod(seg.shape[2:]))

    max_rows = max(8, MAX_LOGITS_TILE_BYTES // (K * 128 * 4))
    n_sp128 = _round_up(n_spatial, 128)
    n_rows = n_sp128 // 128
    tile_rows, n_rows_pad = _choose_rows_tiling(n_rows, max_rows)
    n_sp_pad = n_rows_pad * 128

    # Class-major, lane-dense layout: free reshape of the contiguous NCDHW volume.
    # Keep the input dtype (upcast happens in VMEM inside the kernel).
    logits = seg.reshape(B, K, n_spatial)
    tgt_dtype = jnp.int8 if tile_rows % 32 == 0 else jnp.int32
    tgt = target.reshape(B, n_spatial).astype(tgt_dtype)
    if n_sp_pad != n_spatial:
        # TODO(synk): rare ragged tail (n_spatial % 128 != 0 or no divisor tile);
        # costs one extra copy of the logits volume.
        logits = jnp.pad(logits, ((0, 0), (0, 0), (0, n_sp_pad - n_spatial)))
        tgt = jnp.pad(tgt, ((0, 0), (0, n_sp_pad - n_spatial)), constant_values=-1)
    logits = logits.reshape(B, K, n_rows_pad, 128)
    tgt = tgt.reshape(B, n_rows_pad, 128)

    num_tiles = n_rows_pad // tile_rows
    # Split the tile axis into 2 parallel chunks when exact, so a v7x megacore
    # still has 2-way work at B == 1 (no effect on single-TC v5e/v6e).
    n_chunks = 2 if (num_tiles >= 2 and num_tiles % 2 == 0) else 1
    tiles_per_chunk = num_tiles // n_chunks

    partials = pl.pallas_call(
        ce_kernel,
        out_shape=jax.ShapeDtypeStruct((B, n_chunks, 1, 128), jnp.float32),
        grid_spec=pltpu.PrefetchScalarGridSpec(
            num_scalar_prefetch=0,
            grid=(B, n_chunks, tiles_per_chunk),
            in_specs=[
                pl.BlockSpec((None, K, tile_rows, 128),
                             lambda b, c, i: (b, 0, c * tiles_per_chunk + i, 0)),
                pl.BlockSpec((None, tile_rows, 128),
                             lambda b, c, i: (b, c * tiles_per_chunk + i, 0)),
            ],
            out_specs=pl.BlockSpec((None, None, 1, 128),
                                   lambda b, c, i: (b, c, 0, 0)),
        ),
        compiler_params=pltpu.CompilerParams(
            dimension_semantics=("parallel", "parallel", "arbitrary"),
            vmem_limit_bytes=32 * 1024 * 1024),
    )(logits, tgt)

    total = jnp.sum(partials)                      # single cross-lane reduce
    return total / jnp.float32(B * n_spatial)


# ---------------------------------------------------------------------------
# Kernel 2: PixelContrastLoss._contrastive (queue=None path).
#   Input: anchor features (M=2*n_view, C) in the reference cat(unbind(...,1))
#   row order.  L2-normalize (rsqrt), MXU A@A^T, row-max stabilization, static
#   block masks from iotas, stabilized masked log-prob, exact positive-count
#   division, scalar loss.  Pure latency-bound (~2.5 MFLOP) -> single block.
# ---------------------------------------------------------------------------
def contrast_kernel(x_ref, o_ref):
    x = x_ref[...].astype(jnp.float32)                   # (M, C)
    M = x.shape[0]
    half = M // 2                                        # = n_view = anchor_count

    # F.normalize(p=2, dim=1) via rsqrt (EUP slot).
    sumsq = jnp.sum(x * x, axis=1, keepdims=True)
    a = x * jax.lax.rsqrt(jnp.maximum(sumsq, 1e-24))

    # logits = (A @ A.T) / base_temperature
    logits = jax.lax.dot_general(
        a, a, (((1,), (1,)), ((), ())),
        preferred_element_type=jnp.float32) * (1.0 / BASE_TEMPERATURE)
    logits = logits - jnp.max(logits, axis=1, keepdims=True)

    rows = jax.lax.broadcasted_iota(jnp.int32, (M, M), 0)
    cols = jax.lax.broadcasted_iota(jnp.int32, (M, M), 1)
    # mask = kron([[1,0],[0,1]], ones(half, half))  (contiguous blocks, as in ref)
    same_block = (rows < half) == (cols < half)
    neg_mask = jnp.where(same_block, 0.0, 1.0)
    # logits_mask scatter over arange(anchor_count)=arange(half): diagonal zeroed
    # only for the first `half` rows (reference behavior).
    pos_mask = jnp.where(
        same_block & jnp.logical_not((rows == cols) & (rows < half)), 1.0, 0.0)

    e = jnp.exp(logits)
    neg_sum = jnp.sum(e * neg_mask, axis=1, keepdims=True)
    # log(e / (e + neg_sum)) == logits - log(e + neg_sum)  (stabilized, no divide)
    log_prob = logits - jnp.log(e + neg_sum)

    # mask.sum(1) is the constant {half-1, half}: divide exactly (no approx recip).
    row_ids = jax.lax.broadcasted_iota(jnp.int32, (M, 1), 0)
    inv_count = jnp.where(row_ids < half,
                          jnp.float32(1.0 / (half - 1)), jnp.float32(1.0 / half))
    mean_log_prob_pos = jnp.sum(log_prob * pos_mask, axis=1, keepdims=True) * inv_count
    loss = -jnp.mean(mean_log_prob_pos) * (1.0 / TEMPERATURE)
    o_ref[...] = jnp.broadcast_to(loss, (1, 1))


def contrastive_loss(anchor_feature):
    return pl.pallas_call(
        contrast_kernel,
        out_shape=jax.ShapeDtypeStruct((1, 1), jnp.float32),
        in_specs=[pl.BlockSpec(memory_space=pltpu.MemorySpace.VMEM)],
        out_specs=pl.BlockSpec(memory_space=pltpu.MemorySpace.VMEM),
    )(anchor_feature)[0, 0]


# ---------------------------------------------------------------------------
# Host-side glue: _hard_anchor_sampling index selection only (data-dependent
# nonzero / randperm / ragged concat) on the small int label/prediction maps;
# returns 100 flat pixel indices per batch element.  `rng` is a deterministic
# NumPy Generator standing in for torch.randperm.
# TODO(synk): data-dependent nonzero/randperm has no static-shape Pallas
#             equivalent; index selection stays on host (int8 maps only).
# ---------------------------------------------------------------------------
def hard_anchor_sampling_indices(y_hat, y, rng):
    # y_hat: labels (B, N); y: predictions (B, N)
    B = y_hat.shape[0]
    n_view = N_VIEW
    idx_out = np.zeros((B, n_view), dtype=np.int64)
    for ii in range(B):
        this_y_hat = y_hat[ii]
        this_y = y[ii]
        hard_indices = np.nonzero((this_y_hat == 0) & (this_y == 0))[0]
        easy_out = np.nonzero((this_y_hat == 1) & (this_y == 1))[0]
        easy_in = np.nonzero((this_y_hat == 1) & (this_y != 1))[0]
        t1 = easy_out[rng.permutation(easy_out.shape[0])[:60]]
        t2 = easy_in[rng.permutation(easy_in.shape[0])[:40]]
        easy_indices = np.concatenate([t1, t2], axis=0)
        in_indices = np.nonzero(this_y_hat == 1)[0]
        num_hard = hard_indices.shape[0]
        num_easy = easy_indices.shape[0]
        if num_hard >= n_view / 2 and num_easy >= n_view / 2:
            num_hard_keep = n_view // 2
            num_easy_keep = n_view // 2
        elif num_easy <= n_view / 2:
            easy_indices = np.concatenate(
                [easy_indices, in_indices[:n_view - num_easy]], axis=0)
            num_easy_keep = n_view // 2
            num_hard_keep = n_view // 2
        if num_hard <= n_view / 2:
            hard_indices = np.concatenate(
                [hard_indices, in_indices[:n_view - num_hard]], axis=0)
            num_easy_keep = n_view // 2
            num_hard_keep = n_view // 2
        if num_easy == 0:
            easy_indices = hard_indices
        perm = rng.permutation(num_hard_keep)
        hard_indices = hard_indices[perm[:num_hard_keep]]
        perm = rng.permutation(num_easy_keep)
        easy_indices = easy_indices[perm[:num_easy_keep]]
        idx_out[ii, 0:n_view // 2] = easy_indices
        idx_out[ii, n_view // 2:n_view] = hard_indices
    return idx_out


# ---------------------------------------------------------------------------
# Full forward: ContrastCELoss(seg, target, embed) with queues absent.
# ---------------------------------------------------------------------------
def contrast_ce_loss_forward(seg, target, embed, loss_weight=1.0, with_embed=False):
    B, K = int(seg.shape[0]), int(seg.shape[1])
    C = int(embed.shape[1])
    nb = min(B, 2)                      # reference X_ buffer is hard-coded to 2 rows

    # Dispatch the tiny predict/label maps (first 2 batch rows, int8) BEFORE the
    # CE kernel so their D2H transfer and the host-side index selection overlap
    # with the CE kernel running on device.
    if K == 2:
        predict_nb = (seg[:nb, 1] > seg[:nb, 0]).astype(jnp.int8)
    else:
        predict_nb = jnp.argmax(seg[:nb], axis=1).astype(jnp.int8)
    labels_nb = target[:nb].astype(jnp.int8)

    # ---- seg cross-entropy (tiled Pallas kernel, class-major dense layout) ----
    loss_ce = cross_entropy_loss(seg, target)          # async dispatch

    # Only the small int8 maps go to host for index selection.
    labels_np = np.asarray(labels_nb).reshape(nb, -1)
    predict_np = np.asarray(predict_nb).reshape(nb, -1)

    rng = np.random.default_rng(0)
    idx = hard_anchor_sampling_indices(labels_np, predict_np, rng)

    # Gather the 2*n_view anchor rows ON DEVICE (no full-volume transpose/copy).
    # TODO(synk): the data-dependent gather stays a (tiny) XLA gather rather than
    #             being fused into the contrast pallas_call.
    embed_flat = embed.reshape(B, C, -1)
    idx_dev = jnp.asarray(idx, dtype=jnp.int32)                     # (nb, 100)
    gathered = jnp.take_along_axis(embed_flat[:nb], idx_dev[:, None, :], axis=2)
    X_ = jnp.transpose(gathered, (0, 2, 1))                         # (nb, 100, C)
    if nb < 2:
        X_ = jnp.concatenate(
            [X_, jnp.zeros((2 - nb, N_VIEW, C), X_.dtype)], axis=0)

    # anchor_feature = cat(unbind(X_, dim=1), dim=0) -> (2*n_view, C), rows
    # interleave the two samples exactly as in the reference.
    anchor_feature = jnp.transpose(X_, (1, 0, 2)).reshape(2 * N_VIEW, C)
    loss_contrast = contrastive_loss(anchor_feature)

    if with_embed:
        return loss_ce + loss_weight * loss_contrast
    return loss_ce + 1.0 * loss_contrast


if __name__ == "__main__":
    key = jax.random.PRNGKey(0)
    k1, k2, k3 = jax.random.split(key, 3)

    B, K, C, D, H, W = 2, 2, 32, 4, 8, 16   # small 3D-volume shapes
    seg = jax.random.normal(k1, (B, K, D, H, W), dtype=jnp.float32)
    target = jax.random.randint(k2, (B, D, H, W), 0, K, dtype=jnp.int32)
    embed = jax.random.normal(k3, (B, C, D, H, W), dtype=jnp.float32)

    loss = contrast_ce_loss_forward(seg, target, embed)
    loss = jax.block_until_ready(loss)
    assert np.isfinite(float(loss))
    print("KERNEL_OK")
</pallas_src>

<mosaic_0001>
module attributes {stable_mosaic.version = 11 : i64} {
  func.func @ce_kernel(%arg0: i32, %arg1: i32, %arg2: i32, %arg3: memref<1x2x4x128xf32, #tpu.memory_space<vmem>>, %arg4: memref<1x4x128xi32, #tpu.memory_space<vmem>>, %arg5: memref<1x1x1x128xf32, #tpu.memory_space<vmem>>) attributes {dimension_semantics = [#tpu.dimension_semantics<parallel>, #tpu.dimension_semantics<parallel>, #tpu.dimension_semantics<arbitrary>], iteration_bounds = array<i64: 2, 1, 1>, scalar_prefetch = 0 : i64, scratch_operands = 0 : i64, tpu.core_type = #tpu.core_type<tc>, window_params = [{transform_indices = @transform_0, window_bounds = array<i64: 1, 2, 4, 128>}, {transform_indices = @transform_1, window_bounds = array<i64: 1, 4, 128>}, {transform_indices = @transform_2, window_bounds = array<i64: 1, 1, 1, 128>}]} {
    %c0_i32 = arith.constant 0 : i32
    %0 = arith.cmpi eq, %arg2, %c0_i32 : i32
    %1 = arith.extui %0 : i1 to i32
    %c0_i32_0 = arith.constant 0 : i32
    %2 = arith.cmpi ne, %1, %c0_i32_0 : i32
    scf.if %2 {
      %cst_23 = arith.constant 0.000000e+00 : f32
      %36 = vector.broadcast %cst_23 : f32 to vector<1x128xf32>
      %c0_24 = arith.constant 0 : index
      %c0_25 = arith.constant 0 : index
      %c0_26 = arith.constant 0 : index
      %c0_27 = arith.constant 0 : index
      %37 = vector.load %arg5[%c0_24, %c0_25, %c0_26, %c0_27] : memref<1x1x1x128xf32, #tpu.memory_space<vmem>>, vector<1x1x1x128xf32>
      %38 = vector.shape_cast %37 : vector<1x1x1x128xf32> to vector<1x128xf32>
      %39 = vector.shape_cast %36 : vector<1x128xf32> to vector<1x1x1x128xf32>
      tpu.vector_store %arg5[%c0_24, %c0_25, %c0_26, %c0_27], %39 {strides = array<i32>} : memref<1x1x1x128xf32, #tpu.memory_space<vmem>>, vector<1x1x1x128xf32>,
    } else {
    }
    %c0 = arith.constant 0 : index
    %c0_1 = arith.constant 0 : index
    %c0_2 = arith.constant 0 : index
    %3 = vector.load %arg4[%c0, %c0_1, %c0_2] : memref<1x4x128xi32, #tpu.memory_space<vmem>>, vector<1x4x128xi32>
    %4 = vector.shape_cast %3 : vector<1x4x128xi32> to vector<4x128xi32>
    %c0_i32_3 = arith.constant 0 : i32
    %5 = vector.broadcast %c0_i32_3 : i32 to vector<4x128xi32>
    %6 = arith.cmpi sge, %4, %5 : vector<4x128xi32>
    %c0_4 = arith.constant 0 : index
    %c0_5 = arith.constant 0 : index
    %c0_6 = arith.constant 0 : index
    %c0_7 = arith.constant 0 : index
    %7 = vector.load %arg3[%c0_4, %c0_5, %c0_6, %c0_7] : memref<1x2x4x128xf32, #tpu.memory_space<vmem>>, vector<1x1x4x128xf32>
    %8 = vector.shape_cast %7 : vector<1x1x4x128xf32> to vector<4x128xf32>
    %c0_8 = arith.constant 0 : index
    %c1 = arith.constant 1 : index
    %c0_9 = arith.constant 0 : index
    %c0_10 = arith.constant 0 : index
    %9 = vector.load %arg3[%c0_8, %c1, %c0_9, %c0_10] : memref<1x2x4x128xf32, #tpu.memory_space<vmem>>, vector<1x1x4x128xf32>
    %10 = vector.shape_cast %9 : vector<1x1x4x128xf32> to vector<4x128xf32>
    %c1_i32 = arith.constant 1 : i32
    %11 = vector.broadcast %c1_i32 : i32 to vector<4x128xi32>
    %12 = arith.cmpi eq, %4, %11 : vector<4x128xi32>
    %13 = arith.subf %8, %10 : vector<4x128xf32>
    %14 = arith.subf %10, %8 : vector<4x128xf32>
    %15 = arith.select %12, %13, %14 : vector<4x128xi1>, vector<4x128xf32>
    %cst = arith.constant 0.000000e+00 : f32
    %16 = vector.broadcast %cst : f32 to vector<4x128xf32>
    %17 = arith.maximumf %15, %16 : vector<4x128xf32>
    %18 = math.absf %15 : vector<4x128xf32>
    %cst_11 = arith.constant 0.000000e+00 : f32
    %19 = vector.broadcast %cst_11 : f32 to vector<4x128xf32>
    %20 = arith.subf %19, %18 : vector<4x128xf32>
    %21 = math.exp %20 : vector<4x128xf32>
    %cst_12 = arith.constant 1.000000e+00 : f32
    %22 = vector.broadcast %cst_12 : f32 to vector<4x128xf32>
    %23 = arith.addf %22, %21 : vector<4x128xf32>
    %24 = math.log %23 : vector<4x128xf32>
    %25 = arith.addf %17, %24 : vector<4x128xf32>
    %cst_13 = arith.constant 0.000000e+00 : f32
    %26 = vector.broadcast %cst_13 : f32 to vector<4x128xf32>
    %27 = arith.select %6, %25, %26 : vector<4x128xi1>, vector<4x128xf32>
    %c0_14 = arith.constant 0 : index
    %c0_15 = arith.constant 0 : index
    %c0_16 = arith.constant 0 : index
    %c0_17 = arith.constant 0 : index
    %28 = vector.load %arg5[%c0_14, %c0_15, %c0_16, %c0_17] : memref<1x1x1x128xf32, #tpu.memory_space<vmem>>, vector<1x1x1x128xf32>
    %29 = vector.shape_cast %28 : vector<1x1x1x128xf32> to vector<1x128xf32>
    %cst_18 = arith.constant dense<0.000000e+00> : vector<128xf32>
    %30 = vector.multi_reduction <add>, %27, %cst_18 [0] : vector<4x128xf32> to vector<128xf32>
    %31 = vector.shape_cast %30 : vector<128xf32> to vector<1x128xf32>
    %32 = arith.addf %29, %31 : vector<1x128xf32>
    %c0_19 = arith.constant 0 : index
    %c0_20 = arith.constant 0 : index
    %c0_21 = arith.constant 0 : index
    %c0_22 = arith.constant 0 : index
    %33 = vector.load %arg5[%c0_19, %c0_20, %c0_21, %c0_22] : memref<1x1x1x128xf32, #tpu.memory_space<vmem>>, vector<1x1x1x128xf32>
    %34 = vector.shape_cast %33 : vector<1x1x1x128xf32> to vector<1x128xf32>
    %35 = vector.shape_cast %32 : vector<1x128xf32> to vector<1x1x1x128xf32>
    tpu.vector_store %arg5[%c0_19, %c0_20, %c0_21, %c0_22], %35 {strides = array<i32>} : memref<1x1x1x128xf32, #tpu.memory_space<vmem>>, vector<1x1x1x128xf32>,
    return
  }
  func.func @transform_0(%arg0: i32, %arg1: i32, %arg2: i32) -> (i32, i32, i32, i32) {
    %c1_i32 = arith.constant 1 : i32
    %0 = arith.muli %arg1, %c1_i32 : i32
    %1 = arith.addi %0, %arg2 : i32
    %c0_i32 = arith.constant 0 : i32
    %c0_i32_0 = arith.constant 0 : i32
    %c0_i32_1 = arith.constant 0 : i32
    return %arg0, %c0_i32, %1, %c0_i32_0 : i32, i32, i32, i32
  }
  func.func @transform_1(%arg0: i32, %arg1: i32, %arg2: i32) -> (i32, i32, i32) {
    %c1_i32 = arith.constant 1 : i32
    %0 = arith.muli %arg1, %c1_i32 : i32
    %1 = arith.addi %0, %arg2 : i32
    %c0_i32 = arith.constant 0 : i32
    %c0_i32_0 = arith.constant 0 : i32
    return %arg0, %1, %c0_i32 : i32, i32, i32
  }
  func.func @transform_2(%arg0: i32, %arg1: i32, %arg2: i32) -> (i32, i32, i32, i32) {
    %c0_i32 = arith.constant 0 : i32
    %c0_i32_0 = arith.constant 0 : i32
    %c0_i32_1 = arith.constant 0 : i32
    return %arg0, %arg1, %c0_i32, %c0_i32_0 : i32, i32, i32, i32
  }
}

</mosaic_0001>

<bundles_post_ra>
// kernel: tpu_custom_call.1
= control target key start
LH: loop header
LB: loop body
LE: loop exit
PB: predicated region body
PF: predicated region fallthrough
CT: control target
= control target key end

     0   :  { %7 = vsyncpa [#allocation3], 0  ;;  %s793_s0 = inlined_call_operand.hbm [shape: f32[2,2,4,128], index: 0, kind: input, shape index: {}]   ;;  %s794_s1 = inlined_call_operand.hbm [shape: s32[2,4,128], index: 1, kind: input, shape index: {}]   ;;  %s795_s2 = inlined_call_operand.hbm [shape: f32[2,1,1,128], index: 2, kind: output, shape index: {}]  }
   0x1   :  { %9 = vsyncpa [#allocation3 + $0x1], 0 }
   0x2   :  { %10 = vsyncpa [#allocation6], 0 }
   0x3   :  { %12 = vsyncpa [#allocation6 + $0x1], 0 }
   0x4   :  { %13 = vsyncpa [#allocation4], 0 }
   0x5   :  { %15 = vsyncpa [#allocation4 + $0x1], 0  ;;  %s648_s9 = smov 0   ;;  %s650_s10 = smov 0  }
   0x6   :  { %s652_s11 = smov 0   ;;  %s654_s12 = smov 0  }
   0x7   :  { %s656_s13 = smov 0   ;;  %s658_s14 = smov 0  }
   0x8 LB: > { %s392_s15 = sadd.s32 4294967295, %s628_s14   ;;  %s393_s16 = sadd.s32 4294967294, %s628_s14   ;;  %s628_s14 = sphi %s658_s14, %s21_s14   ;;  %s624_s13 = sphi %s656_s13, %s805_s13   ;;  %s620_s12 = sphi %s654_s12, %s804_s12   ;;  %s616_s11 = sphi %s652_s11, %s803_s11   ;;  %s612_s10 = sphi %s650_s10, %s802_s10   ;;  %s608_s9 = sphi %s648_s9, %s801_s9  }
   0x9   : > { %s40_s17 = sadd.s32 1, %s624_s13  ;;  %s51_s18 = sadd.s32 1, %s616_s11 }
   0xa   : > { %p42_p0 = scmp.ge.s32.totalorder %s40_s17, 2  ;;  %p58_p1 = scmp.ne.s32.totalorder %s616_s11, %s612_s10 }
   0xb   : > { %p59_p2 = scmp.eq.s32.totalorder %s628_s14, 0  ;;  %p64_p3 = scmp.ne.s32.totalorder %s612_s10, %s608_s9 }
   0xc   : > { %s807_s17 = smov (%p42_p0, %s40_s17), 0  ;;  %p65_p5 = scmp.eq.s32.totalorder %s392_s15, 0 }
   0xd   : > { %p689_p4 = por %p59_p2, %p58_p1  ;;  %s46_s20 = ssub.s32 %s624_s13, %s807_s17 }
   0xe   : > { %p120_p6 = scmp.eq.s32.totalorder %s392_s15, 1  ;;  %p49_p7 = scmp.eq.s32.totalorder %s46_s20, 0 }
   0xf   : > { %p695_p8 = por %p65_p5, %p64_p3  ;;  %p126_p10 = scmp.eq.s32.totalorder %s393_s16, 1 }
  0x10   : > { %p699_p9 = por %p120_p6, %p58_p1  ;;  %p395_p12 = scmp.ge.s32.totalorder %s628_s14, 2 }
  0x11   : > { %s704_s23 = scalar_select %p49_p7, %s616_s11, %s51_s18  }
  0x12   : > { %p706_p11 = por %p126_p10, %p64_p3  ;;  %p425_p13 = scmp.lt.s32.totalorder %s628_s14, 2 }
  0x13   : > { %s146_s25 = sand.u32 1, %s616_s11   ;;  %s407_s27 = sshll.u32 %s624_s13, 3 }
  0x14   : > { %s396_s26 = sshll.u32 %s146_s25, 3  ;;  %s157_s30 = scalar_lea.hbm %s793_s0, %s407_s27 }
  0x15   : > { %s150_s3 = scalar_lea.vmem [#allocation2], %s396_s26  ;;  %s158_s5 = sshll.u32 %s157_s30, 4  ;;  %s159_s5 = int_to_ptr.hbm [resolvable:$true] %s158_s5 }
  0x16   : > { %s160_s4 = sshll.u32 %s150_s3, 4  ;;  %p719_p0 = pnand %p425_p13, %p689_p4  ;;  %s161_s4 = int_to_ptr.vmem [resolvable:$true] %s160_s4 }
  0x17   : > { %p401_p1 = scmp.ge.s32.totalorder %s628_s14, 1  ;;  %s147_s7 = scalar_lea.sflag [#allocation3], %s146_s25 }
  0x18   : > { %s630_s8 = smov 64   ;;  %s631_s15 = smov 4  }
  0x19   : > { %417 = dma.hbm_to_vmem [thread:$0]  (!%p719_p0), %s159_s5, 128, %s161_s4, %s147_s7, %s630_s8, %s630_s8, %s631_s15  }
  0x1a   : > { %p189_p2 = scmp.lt.s32.totalorder %s628_s14, 3  ;;  %s399_s16 = sshll.u32 %s146_s25, 2 }
  0x1b   : > { %s400_s18 = sshll.u32 %s624_s13, 2  ;;  %s174_s27 = scalar_lea.vmem [#allocation5], %s399_s16 }
  0x1c   : > { %p190_p3 = pnand %p401_p1, %p189_p2  ;;  %s180_s19 = scalar_lea.hbm %s794_s1, %s400_s18 }
  0x1d   : > { %s184_s28 = sshll.u32 %s174_s27, 4  ;;  %s182_s29 = sshll.u32 %s180_s19, 4  ;;  %s185_s28 = int_to_ptr.vmem [resolvable:$true] %s184_s28  ;;  %s183_s29 = int_to_ptr.hbm [resolvable:$true] %s182_s29 }
  0x1e   : > { %s171_s30 = scalar_lea.sflag [#allocation6], %s146_s25  ;;  %193 = sbr.rel (%p190_p3) target bundleno = 89 (0x59), region = 28 }
  0x1f   : > { %420 = dma.hbm_to_vmem [thread:$0]  (!%p719_p0), %s183_s29, 64, %s185_s28, %s171_s30  }
  0x20   : > { %s734_s3 = sand.u32 (!%p190_p3), 1, %s612_s10  }
  0x21   : > { %s402_s4 = sshll.u32 (!%p190_p3), %s734_s3, 3  ;;  %s196_s5 = scalar_lea.sflag (!%p190_p3), [#allocation3], %s734_s3 }
  0x22   : > { %s199_s7 = scalar_lea.vmem (!%p190_p3), [#allocation2], %s402_s4 }
  0x23   : > { %595 = dma.done.wait (%p695_p8), %s196_s5, 128  }
  0x24   : > { %597 = vsyncadd (%p695_p8), %s196_s5, 4294967168  ;;  %s403_s25 = sshll.u32 %s734_s3, 2  ;;  %s206_s6 = scalar_lea.sflag [#allocation6], %s734_s3 }
  0x25   : > { %s209_s8 = scalar_lea.vmem [#allocation5], %s403_s25 }
  0x26   : > { %599 = dma.done.wait (%p695_p8), %s206_s6, 64  }
  0x27   : > { %601 = vsyncadd (%p695_p8), %s206_s6, 4294967232  ;;  %s749_s15 = scalar_lea.vmem [#allocation7], %s734_s3  ;;  %v632_v0 = vmov 0.0   ;;  %v242_v1 = vld [vmem:[%s209_s8] sm:$0xf]  ;;  %vm262_vm2 = vcmask 1043456   ;;  %s282_s18 = scalar_lea.hbm %s795_s2, %s620_s12 }
  0x28   : > { %241 = vst [vmem:[%s749_s15] sm:$0x1] %v632_v0  ;;  %v244_v2 = vld [vmem:[%s199_s7] sm:$0xf]  ;;  %v404_v3 = vld [vmem:[%s199_s7 + $0x4] sm:$0xf]  ;;  %vm247_vm0 = vcmp.eq.s32.totalorder %v242_v1, 1 }
  0x29   : > { %v248_v4 = vsub.f32 %v244_v2, %v404_v3  ;;  %v249_v5 = vsub.f32 %v404_v3, %v244_v2  ;;  %vm243_vm1 = vcmp.ge.s32.totalorder %v242_v1, 0  ;;  %s284_s20 = sshll.u32 %s749_s15, 4  ;;  %s286_s26 = sshll.u32 %s282_s18, 4  ;;  %s285_s20 = int_to_ptr.vmem [resolvable:$true] %s284_s20  ;;  %s287_s26 = int_to_ptr.hbm [resolvable:$true] %s286_s26 }
  0x2a   : > { %s273_s19 = scalar_lea.sflag [#allocation4], %s734_s3  ;;  %s556_s27 = sshra.s32 %s287_s26, 4  ;;  %s557_s27 = int_to_ptr.hbm [resolvable:$true] %s556_s27 }
  0x2b   : > { %v250_v6 = vsel %vm247_vm0, %v248_v4, %v249_v5  ;;  %s558_s28 = scalar_lea.hbm %s557_s27, 1  ;;  %s562_s12 = scalar_lea.hbm %s795_s2, 2 }
  0x2c   : > { %v252_v7 = vand.u32 2147483647, %v250_v6  ;;  %v251_v12 = vmax.f32 %v250_v6, 0.0  ;;  %p559_p4 = scmp.ne.s32.totalorder %s557_s27, %s558_s28  ;;  %p563_p7 = scmp.lt.s32.totalorder %s557_s27, %s795_s2 }
  0x2d   : > { %p564_p8 = scmp.lt.s32.totalorder %s562_s12, %s558_s28 }
  0x2e   : > { %v253_v8 = vsub.f32 0.0, %v252_v7  ;;  %p560_p5 = pnand %p559_p4, %p699_p9 }
  0x2f   : > { %v261_v23 = vld [vmem:[%s749_s15] sm:$0x1]  ;;  %p565_p10 = por %p564_p8, %p563_p7 }
  0x30   : > { %v254_v9 = vmul.f32 1.442695, %v253_v8  ;;  %p561_p6 = pneg %p560_p5 }
  0x32   : > { %478 = vpow2.f32 %v254_v9  ;;  %p566_p13 = pnand %p565_p10, %p561_p6 }
  0x38   : > { %v479_v10 = vpop.eup %478 }
  0x39   : > { %v256_v11 = vadd.f32 1.0, %v479_v10 }
  0x3b   : > { %480 = vlog2.f32 %v256_v11 }
  0x41   : > { %v481_v13 = vpop.eup %480 }
  0x42   : > { %v258_v14 = vmul.f32 0.6931472, %v481_v13 }
  0x44   : > { %v259_v15 = vadd.f32 %v258_v14, %v251_v12 }
  0x46   : > { %v260_v16 = vsel %vm243_vm1, %v259_v15, 0.0 }
  0x47   : > { %v263_v17 = vsel %vm262_vm2, %v260_v16, 0.0 }
  0x48   : > { %v264_v18 = vrot.slane %v263_v17, 4 }
  0x4a   : > { %v265_v19 = vadd.f32 %v264_v18, %v263_v17 }
  0x4c   : > { %v266_v20 = vrot.slane %v265_v19, 2 }
  0x4e   : > { %v267_v21 = vadd.f32 %v266_v20, %v265_v19 }
  0x50   : > { %v268_v22 = vrot.slane %v267_v21, 1 }
  0x52   : > { %v269_v24 = vadd.f32 %v268_v22, %v267_v21 }
  0x54   : > { %v270_v25 = vadd.f32 %v269_v24, %v261_v23 }
  0x56   : > { %271 = vst [vmem:[%s749_s15] sm:$0x1] %v270_v25 }
  0x57   : > { %569 = shalt.err (!%p566_p13)
}
  0x58   : > { %412 = dma.vmem_to_hbm [thread:$0]  (%p699_p9), %s285_s20, 16, %s287_s26, %s273_s19  }
  0x59 PF: > { %s298_s3 = sand.u32 1, %s608_s9   ;;  %p422_p0 = pnand %p395_p12, %p706_p11 }
  0x5a   : > { %s299_s7 = scalar_lea.sflag [#allocation4], %s298_s3 }
  0x5b   : > { %p423_p1 = pneg %p422_p0 }
  0x5d   : > { %603 = dma.done.wait (%p423_p1), %s299_s7, 16  }
  0x5e   : > { %605 = vsyncadd (%p423_p1), %s299_s7, 4294967280  ;;  %s21_s14 = sadd.s32 1, %s628_s14   ;;  %s801_s9 = smov %s612_s10 }
  0x5f   : > { %p18_p2 = scmp.ge.s32.totalorder %s21_s14, 4   ;;  %s802_s10 = smov %s616_s11 }
  0x60   : > { %s803_s11 = smov %s704_s23  ;;  %s804_s12 = smov %s624_s13 }
  0x61   : > { %s805_s13 = smov %s807_s17  ;;  %20 = sbr.rel (!%p18_p2) target bundleno = 8 (0x8), region = 91 }
  0x66   :  { %304 = vsyncpa [#allocation3], 1 }
  0x67   :  { %306 = vsyncpa [#allocation3 + $0x1], 1 }
  0x68   :  { %307 = vsyncpa [#allocation6], 1 }
  0x69   :  { %309 = vsyncpa [#allocation6 + $0x1], 1 }
  0x6a   :  { %310 = vsyncpa [#allocation4], 1 }
  0x6b   :  { %312 = vsyncpa [#allocation4 + $0x1], 1 }

</bundles_post_ra>
